<compile_context>
chip_gen: v7x
topology: tpu7x:2x2x1
jax: 0.10.0
libtpu: 0.0.40
codegen_flags: <defaults>
</compile_context>

<pallas_src>
import functools
import math

import jax
import jax.numpy as jnp
from jax.experimental import pallas as pl
from jax.experimental.pallas import tpu as pltpu

_LANE = 128


def _round_up(x: int, n: int) -> int:
    return ((x + n - 1) // n) * n


def _scaled_norm_kernel(x_ref, dist_ref, dir_ref, *, inv_r):
    # x_ref: (D, Tc) -- vector components on sublanes, flattened index on lanes.
    xf = x_ref[...].astype(jnp.float32)
    sq = jnp.sum(xf * xf, axis=0, keepdims=True)          # (1, Tc) sublane reduce (XLU)
    inv = jax.lax.rsqrt(sq)                               # single EUP op per column
    dir_ref[...] = (xf * inv).astype(dir_ref.dtype)       # VPU broadcast-mul
    norm = jnp.where(sq > 0.0, sq * inv, 0.0)             # ||x||; exact 0 for zero rows
    dist_ref[...] = (norm * inv_r).astype(dist_ref.dtype)


def scaled_norm_soa(x_t: jax.Array, r: float, *, max_tile_cols: int = 64 * 1024):
    """Preferred SoA entry point: x_t has shape (D, M) (components first).

    Returns (dist, dir) with shapes (1, M) and (D, M). No layout copies: use
    this directly if the surrounding model keeps the (D, M) layout end-to-end.
    """
    d, m = x_t.shape
    dtype = x_t.dtype
    itemsize = jnp.dtype(dtype).itemsize

    m_aligned = _round_up(m, _LANE)
    # >= 2 grid steps for mid/large inputs so the "parallel" axis shards across
    # v7x's two TensorCores; cap the tile at 64K columns so the double-buffered
    # VMEM footprint (2 * (8+8+8) sublanes * Tc * 4 B ~= 192*Tc) stays ~12 MiB,
    # inside every generation's default scoped-VMEM limit.
    min_tiles = 2 if m_aligned > 2048 else 1
    tile_cols = min(max_tile_cols, _round_up(pl.cdiv(m_aligned, min_tiles), _LANE))
    n_tiles = pl.cdiv(m, tile_cols)

    kernel = functools.partial(_scaled_norm_kernel, inv_r=1.0 / float(r))

    cost = pl.CostEstimate(
        flops=(3 * d + 1) * m,
        transcendentals=m,
        bytes_accessed=(2 * d + 1) * m * itemsize,
    )

    dist2d, dir2d = pl.pallas_call(
        kernel,
        out_shape=(
            jax.ShapeDtypeStruct((1, m), dtype),
            jax.ShapeDtypeStruct((d, m), dtype),
        ),
        grid_spec=pltpu.PrefetchScalarGridSpec(
            num_scalar_prefetch=0,
            grid=(n_tiles,),
            in_specs=[pl.BlockSpec((d, tile_cols), lambda i: (0, i))],
            out_specs=(
                pl.BlockSpec((1, tile_cols), lambda i: (0, i)),
                pl.BlockSpec((d, tile_cols), lambda i: (0, i)),
            ),
        ),
        compiler_params=pltpu.CompilerParams(
            dimension_semantics=("parallel",),
        ),
        cost_estimate=cost,
    )(x_t)
    return dist2d, dir2d


def scaled_norm(disp: jax.Array, r: float, *, max_tile_cols: int = 64 * 1024):
    """Module-compatible wrapper: disp (..., D) -> (dist (..., 1), dir (..., D)).

    NOTE(perf): the AoS->SoA transpose on the way in and the SoA->AoS transpose
    of `dir` on the way out each cost one extra HBM pass; if the surrounding
    model can produce/consume the (D, M) layout, call `scaled_norm_soa` directly.
    """
    orig_shape = disp.shape
    d = orig_shape[-1]
    lead = orig_shape[:-1]
    m = math.prod(lead) if lead else 1

    x_t = disp.reshape(m, d).T                   # (D, M) SoA layout (one XLA copy)
    dist2d, dir2d = scaled_norm_soa(x_t, r, max_tile_cols=max_tile_cols)

    dist = dist2d.reshape(*lead, 1)
    dir_ = dir2d.T.reshape(*lead, d)
    return dist, dir_


if __name__ == "__main__":
    r = 5.0

    # Small shape consistent with the module: interatomic displacement vectors
    # (num_atoms=8, num_neighbors=16, 3).
    disp = jax.random.normal(jax.random.PRNGKey(0), (8, 16, 3), dtype=jnp.float32)
    dist, dir_ = scaled_norm(disp, r)
    dist = jax.block_until_ready(dist)
    dir_ = jax.block_until_ready(dir_)

    ref_norm = jnp.linalg.norm(disp, axis=-1, keepdims=True)
    assert dist.shape == (8, 16, 1) and dir_.shape == (8, 16, 3)
    assert dist.dtype == disp.dtype and dir_.dtype == disp.dtype
    assert jnp.allclose(dist, ref_norm / r, atol=1e-6, rtol=1e-5), "dist mismatch"
    assert jnp.allclose(dir_, disp / ref_norm, atol=1e-6, rtol=1e-5), "dir mismatch"

    # Non-128-multiple flattened size exercises the partial-final-block path
    # (no explicit padding, no output re-slicing).
    disp2 = jax.random.normal(jax.random.PRNGKey(1), (200, 3), dtype=jnp.float32)
    d2, u2 = scaled_norm(disp2, r)
    d2 = jax.block_until_ready(d2)
    u2 = jax.block_until_ready(u2)
    n2 = jnp.linalg.norm(disp2, axis=-1, keepdims=True)
    assert jnp.allclose(d2, n2 / r, atol=1e-6, rtol=1e-5), "dist mismatch (partial block)"
    assert jnp.allclose(u2, disp2 / n2, atol=1e-6, rtol=1e-5), "dir mismatch (partial block)"

    # SoA fast path (no layout copies): (3, M) in -> ((1, M), (3, M)) out.
    x_t = jax.random.normal(jax.random.PRNGKey(2), (3, 384), dtype=jnp.float32)
    dt, ut = scaled_norm_soa(x_t, r)
    dt = jax.block_until_ready(dt)
    ut = jax.block_until_ready(ut)
    nt = jnp.linalg.norm(x_t, axis=0, keepdims=True)
    assert jnp.allclose(dt, nt / r, atol=1e-6, rtol=1e-5), "dist mismatch (SoA)"
    assert jnp.allclose(ut, x_t / nt, atol=1e-6, rtol=1e-5), "dir mismatch (SoA)"

    print("KERNEL_OK")
</pallas_src>

<mosaic_0001>
module attributes {stable_mosaic.version = 11 : i64} {
  func.func @_scaled_norm_kernel(%arg0: i32, %arg1: memref<3x128xf32, #tpu.memory_space<vmem>>, %arg2: memref<1x128xf32, #tpu.memory_space<vmem>>, %arg3: memref<3x128xf32, #tpu.memory_space<vmem>>) attributes {dimension_semantics = [#tpu.dimension_semantics<parallel>], iteration_bounds = array<i64: 1>, scalar_prefetch = 0 : i64, scratch_operands = 0 : i64, tpu.core_type = #tpu.core_type<tc>, window_params = [{transform_indices = @transform_0, window_bounds = array<i64: 3, 128>}, {transform_indices = @transform_1, window_bounds = array<i64: 1, 128>}, {transform_indices = @transform_2, window_bounds = array<i64: 3, 128>}]} {
    %c0 = arith.constant 0 : index
    %c0_0 = arith.constant 0 : index
    %0 = vector.load %arg1[%c0, %c0_0] : memref<3x128xf32, #tpu.memory_space<vmem>>, vector<3x128xf32>
    %1 = arith.mulf %0, %0 : vector<3x128xf32>
    %cst = arith.constant dense<0.000000e+00> : vector<128xf32>
    %2 = vector.multi_reduction <add>, %1, %cst [0] : vector<3x128xf32> to vector<128xf32>
    %3 = vector.shape_cast %2 : vector<128xf32> to vector<1x128xf32>
    %4 = math.rsqrt %3 : vector<1x128xf32>
    %5 = vector.broadcast %4 : vector<1x128xf32> to vector<3x128xf32>
    %6 = arith.mulf %0, %5 : vector<3x128xf32>
    %c0_1 = arith.constant 0 : index
    %c0_2 = arith.constant 0 : index
    %7 = vector.load %arg3[%c0_1, %c0_2] : memref<3x128xf32, #tpu.memory_space<vmem>>, vector<3x128xf32>
    tpu.vector_store %arg3[%c0_1, %c0_2], %6 {strides = array<i32>} : memref<3x128xf32, #tpu.memory_space<vmem>>, vector<3x128xf32>,
    %cst_3 = arith.constant 0.000000e+00 : f32
    %8 = vector.broadcast %cst_3 : f32 to vector<1x128xf32>
    %9 = arith.cmpf ogt, %3, %8 : vector<1x128xf32>
    %10 = arith.mulf %3, %4 : vector<1x128xf32>
    %cst_4 = arith.constant 0.000000e+00 : f32
    %11 = vector.broadcast %cst_4 : f32 to vector<1x128xf32>
    %12 = arith.select %9, %10, %11 : vector<1x128xi1>, vector<1x128xf32>
    %cst_5 = arith.constant 2.000000e-01 : f32
    %13 = vector.broadcast %cst_5 : f32 to vector<1x128xf32>
    %14 = arith.mulf %12, %13 : vector<1x128xf32>
    %c0_6 = arith.constant 0 : index
    %c0_7 = arith.constant 0 : index
    %15 = vector.load %arg2[%c0_6, %c0_7] : memref<1x128xf32, #tpu.memory_space<vmem>>, vector<1x128xf32>
    tpu.vector_store %arg2[%c0_6, %c0_7], %14 {strides = array<i32>} : memref<1x128xf32, #tpu.memory_space<vmem>>, vector<1x128xf32>,
    return
  }
  func.func @transform_0(%arg0: i32) -> (i32, i32) {
    %c0_i32 = arith.constant 0 : i32
    %c0_i32_0 = arith.constant 0 : i32
    return %c0_i32, %arg0 : i32, i32
  }
  func.func @transform_1(%arg0: i32) -> (i32, i32) {
    %c0_i32 = arith.constant 0 : i32
    %c0_i32_0 = arith.constant 0 : i32
    return %c0_i32, %arg0 : i32, i32
  }
  func.func @transform_2(%arg0: i32) -> (i32, i32) {
    %c0_i32 = arith.constant 0 : i32
    %c0_i32_0 = arith.constant 0 : i32
    return %c0_i32, %arg0 : i32, i32
  }
}

</mosaic_0001>

<bundles_post_ra>
// kernel: tpu_custom_call.1
= control target key start
LH: loop header
LB: loop body
LE: loop exit
PB: predicated region body
PF: predicated region fallthrough
CT: control target
= control target key end

     0   :  { %8 = vsyncpa [#allocation3], 0  ;;  %s210_s0 = inlined_call_operand.hbm [shape: f32[3,128], index: 0, kind: input, shape index: {}]   ;;  %s211_s1 = inlined_call_operand.hbm [shape: f32[1,128], index: 1, kind: output, shape index: {0}]   ;;  %s212_s2 = inlined_call_operand.hbm [shape: f32[3,128], index: 2, kind: output, shape index: {1}]  }
   0x1   :  { %9 = vsyncpa [#allocation4], 0 }
   0x2   :  { %10 = vsyncpa [#allocation7], 0  ;;  %s148_s9 = smov [#allocation2]   ;;  %s76_s13 = scalar_lea.hbm %s210_s0, 64 }
   0x3   :  { %s17_s10 = sshll.u32 %s148_s9, 4  ;;  %p77_p0 = scmp.ne.s32.totalorder %s210_s0, %s76_s13  ;;  %s18_s10 = int_to_ptr.vmem [resolvable:$true] %s17_s10 }
   0x4   :  { %p80_p1 = scmp.lt.u32.totalorder %s76_s13, %s210_s0 }
   0x6   :  { %p82_p2 = pnand %p80_p1, %p77_p0 }
   0x8   :  { %85 = shalt.err (!%p82_p2)
}
   0x9   :  { %s86_s18 = scalar_lea.vmem %s18_s10, 64  ;;  %p91_p4 = scmp.lt.s32.totalorder %s18_s10, %s18_s10 }
   0xa   :  { %p87_p3 = scmp.ne.s32.totalorder %s18_s10, %s86_s18  ;;  %p92_p5 = scmp.lt.s32.totalorder %s86_s18, %s86_s18 }
   0xc   :  { %p93_p6 = por %p92_p5, %p91_p4 }
   0xe   :  { %p94_p7 = pnand %p93_p6, %p87_p3 }
  0x10   :  { %97 = shalt.err (!%p94_p7)
}
  0x11   :  { %20 = dma.hbm_to_vmem [thread:$0]  %s210_s0, 64, %s18_s10, [#allocation3]  }
  0x12   :  { %142 = dma.done.wait [#allocation3], 64  }
  0x13   :  { %143 = vsyncadd [#allocation3], 4294967232  ;;  %v24_v0 = vld [vmem:[#allocation2] sm:$0x7]  ;;  %vm26_vm0 = vcmask 1042432   ;;  %s149_s21 = smov [#allocation6]  }
  0x14   :  { %v25_v1 = vmul.f32 %v24_v0, %v24_v0  ;;  %s58_s22 = sshll.u32 %s149_s21, 4  ;;  %s150_s23 = smov [#allocation5]   ;;  %s59_s22 = int_to_ptr.vmem [resolvable:$true] %s58_s22 }
  0x15   :  { %s48_s24 = sshll.u32 %s150_s23, 4  ;;  %s98_s0 = scalar_lea.vmem %s59_s22, 64  ;;  %s178_s24 = int_to_ptr.vmem [resolvable:$true] %s48_s24 }
  0x16   :  { %v27_v2 = vsel %vm26_vm0, %v25_v1, 0.0  ;;  %p99_p8 = scmp.ne.s32.totalorder %s59_s22, %s98_s0  ;;  %p103_p9 = scmp.lt.s32.totalorder %s59_s22, %s59_s22 }
  0x17   :  { %v28_v3 = vrot.slane %v27_v2, 4  ;;  %p104_p10 = scmp.lt.s32.totalorder %s98_s0, %s98_s0 }
  0x19   :  { %v29_v4 = vadd.f32 %v28_v3, %v27_v2  ;;  %p105_p11 = por %p104_p10, %p103_p9 }
  0x1b   :  { %v30_v5 = vrot.slane %v29_v4, 2  ;;  %p106_p12 = pnand %p105_p11, %p99_p8 }
  0x1d   :  { %v31_v6 = vadd.f32 %v30_v5, %v29_v4 }
  0x1f   :  { %v32_v7 = vrot.slane %v31_v6, 1 }
  0x21   :  { %v33_v8 = vadd.f32 %v32_v7, %v31_v6 }
  0x23   :  { %74 = vrsqrt.f32 %v33_v8  ;;  %vm37_vm1 = vcmp.gt.f32.partialorder %v33_v8, 0.0 }
  0x2d   :  { %v75_v9 = vpop.eup %74 }
  0x2e   :  { %v35_v10 = vmul.f32 %v75_v9, %v24_v0  ;;  %v38_v11 = vmul.f32 %v75_v9, %v33_v8 }
  0x30   :  { %36 = vst [vmem:[#allocation6] sm:$0x7] %v35_v10  ;;  %v39_v12 = vsel %vm37_vm1, %v38_v11, 0.0 }
  0x31   :  { %v40_v13 = vmul.f32 0.2, %v39_v12 }
  0x32   :  { %109 = shalt.err (!%p106_p12)
}
  0x33   :  { %s110_s27 = scalar_lea.hbm %s212_s2, 64 }
  0x34   :  { %p111_p13 = scmp.ne.s32.totalorder %s212_s2, %s110_s27  ;;  %p114_p0 = scmp.lt.u32.totalorder %s110_s27, %s212_s2 }
  0x36   :  { %p116_p1 = pnand %p114_p0, %p111_p13 }
  0x38   :  { %119 = shalt.err (!%p116_p1)
}
  0x39   :  { %61 = dma.vmem_to_hbm [thread:$0]  %s59_s22, 64, %s212_s2, [#allocation7]   ;;  %41 = vst [vmem:[#allocation5] sm:$0x1] %v40_v13 }
  0x3a   :  { %s120_s6 = scalar_lea.vmem %s178_s24, 16  ;;  %s124_s7 = scalar_lea.vmem %s178_s24, 32 }
  0x3b   :  { %p121_p2 = scmp.ne.s32.totalorder %s178_s24, %s120_s6  ;;  %p125_p3 = scmp.lt.s32.totalorder %s178_s24, %s178_s24 }
  0x3c   :  { %p126_p4 = scmp.lt.s32.totalorder %s124_s7, %s120_s6 }
  0x3e   :  { %p127_p5 = por %p126_p4, %p125_p3 }
  0x40   :  { %p128_p6 = pnand %p127_p5, %p121_p2 }
  0x42   :  { %131 = shalt.err (!%p128_p6)
}
  0x43   :  { %s132_s10 = scalar_lea.hbm %s211_s1, 16 }
  0x44   :  { %p133_p7 = scmp.ne.s32.totalorder %s211_s1, %s132_s10  ;;  %p136_p8 = scmp.lt.u32.totalorder %s132_s10, %s211_s1 }
  0x46   :  { %p138_p9 = pnand %p136_p8, %p133_p7 }
  0x48   :  { %141 = shalt.err (!%p138_p9)
}
  0x49   :  { %51 = dma.vmem_to_hbm [thread:$0]  %s178_s24, 16, %s211_s1, [#allocation4]  }
  0x4a   :  { %144 = dma.done.wait [#allocation4], 16  }
  0x4b   :  { %145 = vsyncadd [#allocation4], 4294967280 }
  0x4c   :  { %146 = dma.done.wait [#allocation7], 64  }
  0x4d   :  { %147 = vsyncadd [#allocation7], 4294967232 }
  0x4e   :  { %68 = vsyncpa [#allocation3], 1 }
  0x4f   :  { %69 = vsyncpa [#allocation4], 1 }
  0x50   :  { %70 = vsyncpa [#allocation7], 1 }

</bundles_post_ra>
